<compile_context>
chip_gen: v5e
topology: v5e:2x2
jax: 0.10.0
libtpu: 0.0.40
codegen_flags: <defaults>
</compile_context>

<pallas_src>
import math
import functools

import jax
import jax.numpy as jnp
from jax import lax
from jax.experimental import pallas as pl
from jax.experimental.pallas import tpu as pltpu


# ----------------------------------------------------------------------------
# Pass A: classifier + softmax + top-1 / top-2 selection (parallel over tiles)
# ----------------------------------------------------------------------------
def _router_topk_kernel(x_ref, w_ref, gates_ref, idx_ref, counts_ref, *,
                        t_actual, tile_t, needs_row_mask, e_actual,
                        needs_e_mask):
    E_pad = counts_ref.shape[-1]
    T_blk = gates_ref.shape[0]

    x = x_ref[...]                       # (TILE_T, H) in input dtype (no HBM f32 copy)
    w = w_ref[...]                       # (H, E_pad) float32 (router dtype)

    # classifier (router_bias=False); accumulate in f32 on the MXU.
    logits = jnp.dot(x, w, preferred_element_type=jnp.float32)   # (TILE_T, E_pad)

    e_iota = lax.broadcasted_iota(jnp.int32, (T_blk, E_pad), 1)
    if needs_e_mask:
        # lane-padded expert columns must never win the softmax / argmax.
        logits = jnp.where(e_iota < e_actual, logits, -jnp.inf)

    # softmax over experts in float32; approximate reciprocal on the (idle) EUP
    # is safe here: the denominator cancels exactly in the p1/(p1+p2) ratio.
    m = jnp.max(logits, axis=-1, keepdims=True)
    ex = jnp.exp(logits - m)
    inv_den = pl.reciprocal(jnp.sum(ex, axis=-1, keepdims=True), approx=True)
    probs = ex * inv_den

    # top-1 expert from logits (reuse m); first occurrence of max (argmax tie-break).
    is_max1 = logits == m
    idx1 = jnp.min(jnp.where(is_max1, e_iota, E_pad), axis=-1, keepdims=True)
    top1 = e_iota == idx1                                        # bool one-hot

    # top-2 expert: argmax of logits with the top-1 slot masked to -inf.
    masked_logits = jnp.where(top1, -jnp.inf, logits)
    m2 = jnp.max(masked_logits, axis=-1, keepdims=True)
    is_max2 = masked_logits == m2
    idx2 = jnp.min(jnp.where(is_max2, e_iota, E_pad), axis=-1, keepdims=True)
    top2 = e_iota == idx2

    # gate values at the selected experts (pre-capacity).
    p1 = jnp.sum(jnp.where(top1, probs, 0.0), axis=-1, keepdims=True)
    p2 = jnp.sum(jnp.where(top2, probs, 0.0), axis=-1, keepdims=True)

    if needs_row_mask:
        # padded rows must not consume expert capacity: drop them from counts
        # and tag their indices with -1 so Pass B rebuilds all-zero one-hots.
        row = (pl.program_id(0) * tile_t
               + lax.broadcasted_iota(jnp.int32, (T_blk, 1), 0))
        valid = row < t_actual                                   # (TILE_T, 1) bool
        idx1 = jnp.where(valid, idx1, -1)
        idx2 = jnp.where(valid, idx2, -1)
        top1 = jnp.logical_and(top1, valid)
        top2 = jnp.logical_and(top2, valid)

    # per-tile pre-capacity counts (exact small integers in f32).
    cnt1 = jnp.sum(top1.astype(jnp.float32), axis=0, keepdims=True)   # (1, E_pad)
    cnt2 = jnp.sum(top2.astype(jnp.float32), axis=0, keepdims=True)

    gates_ref[...] = jnp.concatenate([p1, p2], axis=-1)
    idx_ref[...] = jnp.concatenate([idx1, idx2], axis=-1).astype(jnp.int32)
    counts_ref[...] = jnp.concatenate([cnt1, cnt2], axis=0).reshape(1, 2, E_pad)


# ----------------------------------------------------------------------------
# Pass B: per-tile cumsum + capacity drop + normalization (fully parallel)
# ----------------------------------------------------------------------------
def _router_capacity_kernel(gates_ref, idx_ref, off_ref, tri_ref,
                            mask_ref, out_ref, *, capacity, eps):
    E_pad = mask_ref.shape[-1]
    T_blk = mask_ref.shape[0]

    idx = idx_ref[...]                   # (TILE_T, 2) int32 (-1 = padded row)
    gates = gates_ref[...]               # (TILE_T, 2) float32
    off = off_ref[...]                   # (1, 2, E_pad) float32 exclusive offsets

    # rebuild one-hots from indices (cheap VPU iota compare); bf16 for the MXU.
    e_iota = lax.broadcasted_iota(jnp.int32, (T_blk, E_pad), 1)
    top1 = (e_iota == idx[:, 0:1]).astype(jnp.bfloat16)
    top2 = (e_iota == idx[:, 1:2]).astype(jnp.bfloat16)

    # per-tile inclusive cumsum via a resident bf16 tri-matmul (MXU); counts are
    # exact because 0/1 operands accumulate in f32.  (bf16 kept for v7x's
    # integer-less MXU.)
    tri = tri_ref[...]                   # (TILE_T, TILE_T) lower-triangular bf16
    cum1 = jnp.dot(tri, top1, preferred_element_type=jnp.float32)
    cum2 = jnp.dot(tri, top2, preferred_element_type=jnp.float32)

    loc1 = cum1 - 1.0 + off[:, 0, :]     # offsets already include the global
    loc2 = cum2 - 1.0 + off[:, 1, :]     # top-1 total for the top-2 locations.

    cap = jnp.float32(capacity)
    t1f = jnp.where(loc1 < cap, top1.astype(jnp.float32), 0.0)
    t2f = jnp.where(loc2 < cap, top2.astype(jnp.float32), 0.0)

    # normalize_router_probabilities (after dropping, since
    # normalize_router_prob_before_dropping=False by default).
    keep1 = jnp.sum(t1f, axis=-1, keepdims=True)   # 1.0 if kept else 0.0
    keep2 = jnp.sum(t2f, axis=-1, keepdims=True)
    p1 = gates[:, 0:1] * keep1
    p2 = gates[:, 1:2] * keep2
    denom = jnp.maximum(p1 + p2, jnp.float32(eps))
    g1 = p1 / denom                      # exact division (bit-parity with ref)
    g2 = p2 / denom

    mask_ref[...] = t1f.astype(jnp.int32)
    out_ref[...] = (g1 * t1f + g2 * t2f).astype(out_ref.dtype)


# ----------------------------------------------------------------------------
# Wrapper
# ----------------------------------------------------------------------------
def _vmem_limit(est_bytes):
    # explicit budget; cap at 40 MiB so it is safe on v7x's 64 MiB VMEM.
    return int(min(max(est_bytes + (4 << 20), 16 << 20), 40 << 20))


def fsgpt_moe_top2_router(hidden_states, w, *, num_experts,
                          expert_capacity=None, training=True,
                          moe_eval_capacity_token_fraction=-1.0,
                          tile_t=512):
    """JAX/Pallas equivalent of FSGPTMoETop2Router.forward (defaults:
    router_bias=False, second_expert_policy='all',
    normalize_router_prob_before_dropping=False, batch_prioritized_routing=False,
    padding_mask=None)."""
    B, S, H = hidden_states.shape
    T = B * S
    E = num_experts
    input_dtype = hidden_states.dtype

    x = hidden_states.reshape(T, H)      # keep input dtype; no HBM f32 copy

    # expert capacity (static, as in route_tokens)
    if (not training) and moe_eval_capacity_token_fraction > 0:
        capacity = math.ceil(moe_eval_capacity_token_fraction * T)
    else:
        cap = 2 * math.ceil(T / E)
        capacity = cap if expert_capacity is None else expert_capacity

    # lane-dense expert axis: pad E up to a multiple of 128 for all (T, E)
    # intermediates/outputs; padded columns are masked to -inf in Pass A.
    E_pad = ((E + 127) // 128) * 128
    needs_e_mask = E_pad != E
    if needs_e_mask:
        w = jnp.pad(w, ((0, 0), (0, E_pad - E)))

    # token tiling: one tile size for both passes (512 keeps the Pass A stream
    # near the HBM roofline while the (TILE_T, TILE_T) tri-matmul stays cheap).
    TILE_T = min(tile_t, ((T + 7) // 8) * 8)
    T_pad = ((T + TILE_T - 1) // TILE_T) * TILE_T
    needs_row_mask = T_pad != T
    if needs_row_mask:
        x = jnp.pad(x, ((0, T_pad - T), (0, 0)))
    n_tiles = T_pad // TILE_T

    itm = jnp.dtype(input_dtype).itemsize
    est_a = (2 * TILE_T * H * itm + 2 * H * E_pad * 4
             + 4 * TILE_T * 2 * 4 + 2 * 2 * E_pad * 4
             + 12 * TILE_T * E_pad * 4)
    est_b = (4 * TILE_T * 2 * 4 + 2 * 2 * E_pad * 4
             + 2 * TILE_T * TILE_T * 2
             + 2 * TILE_T * E_pad * (4 + itm) + 12 * TILE_T * E_pad * 4)

    # ---- Pass A: matmul + softmax + top-1/top-2 (parallel over tiles) ----
    kernel_a = functools.partial(_router_topk_kernel, t_actual=T,
                                 tile_t=TILE_T, needs_row_mask=needs_row_mask,
                                 e_actual=E, needs_e_mask=needs_e_mask)
    gates, idxs, counts = pl.pallas_call(
        kernel_a,
        out_shape=(jax.ShapeDtypeStruct((T_pad, 2), jnp.float32),
                   jax.ShapeDtypeStruct((T_pad, 2), jnp.int32),
                   jax.ShapeDtypeStruct((n_tiles, 2, E_pad), jnp.float32)),
        grid=(n_tiles,),
        in_specs=[pl.BlockSpec((TILE_T, H), lambda i: (i, 0)),
                  pl.BlockSpec((H, E_pad), lambda i: (0, 0))],
        out_specs=(pl.BlockSpec((TILE_T, 2), lambda i: (i, 0)),
                   pl.BlockSpec((TILE_T, 2), lambda i: (i, 0)),
                   pl.BlockSpec((1, 2, E_pad), lambda i: (i, 0, 0))),
        compiler_params=pltpu.CompilerParams(
            dimension_semantics=("parallel",),
            vmem_limit_bytes=_vmem_limit(est_a)),
    )(x, w)

    # tiny XLA glue: global top-1 total + exclusive per-tile prefixes so Pass B
    # carries no state and can run fully parallel (both TCs on v7x).
    total1 = jnp.sum(counts[:, 0, :], axis=0, keepdims=True)      # (1, E_pad)
    excl = jnp.cumsum(counts, axis=0) - counts                    # exclusive prefix
    off1 = excl[:, 0, :]                                          # (n_tiles, E_pad)
    off2 = excl[:, 1, :] + total1                                 # + GLOBAL top-1 count
    offsets = jnp.stack([off1, off2], axis=1)                     # (n_tiles, 2, E_pad)

    # resident lower-triangular bf16 matrix for the per-tile cumsum (constant
    # index_map -> DMA'd once per core, reused every grid step).
    r = jnp.arange(TILE_T)
    tri = (r[:, None] >= r[None, :]).astype(jnp.bfloat16)         # (TILE_T, TILE_T)

    # ---- Pass B: cumsum + capacity + normalization (parallel over tiles) ----
    kernel_b = functools.partial(_router_capacity_kernel, capacity=capacity,
                                 eps=float(jnp.finfo(input_dtype).eps))
    top_1_mask, router_probs = pl.pallas_call(
        kernel_b,
        out_shape=(jax.ShapeDtypeStruct((T_pad, E_pad), jnp.int32),
                   jax.ShapeDtypeStruct((T_pad, E_pad), input_dtype)),
        grid=(n_tiles,),
        in_specs=[pl.BlockSpec((TILE_T, 2), lambda i: (i, 0)),
                  pl.BlockSpec((TILE_T, 2), lambda i: (i, 0)),
                  pl.BlockSpec((1, 2, E_pad), lambda i: (i, 0, 0)),
                  pl.BlockSpec((TILE_T, TILE_T), lambda i: (0, 0))],
        out_specs=(pl.BlockSpec((TILE_T, E_pad), lambda i: (i, 0)),
                   pl.BlockSpec((TILE_T, E_pad), lambda i: (i, 0))),
        compiler_params=pltpu.CompilerParams(
            dimension_semantics=("parallel",),
            vmem_limit_bytes=_vmem_limit(est_b)),
    )(gates, idxs, offsets, tri)

    if needs_row_mask or needs_e_mask:
        top_1_mask = top_1_mask[:T, :E]
        router_probs = router_probs[:T, :E]
    return top_1_mask, router_probs


if __name__ == "__main__":
    # Small config consistent with the module: batch=2, seq=8, hidden=32, experts=128
    B, S, H, E = 2, 8, 32, 128

    key = jax.random.PRNGKey(0)
    k_x, k_w = jax.random.split(key)

    hidden_states = jax.random.normal(k_x, (B, S, H), dtype=jnp.float32)

    # Deterministic nn.Linear(H, E, bias=False) init: U(-1/sqrt(H), 1/sqrt(H)),
    # stored transposed as (H, E) for the kernel.
    bound = 1.0 / math.sqrt(H)
    w = jax.random.uniform(k_w, (H, E), dtype=jnp.float32,
                           minval=-bound, maxval=bound)

    top_1_mask, router_probs = fsgpt_moe_top2_router(hidden_states, w,
                                                     num_experts=E)
    jax.block_until_ready((top_1_mask, router_probs))

    assert top_1_mask.shape == (B * S, E)
    assert router_probs.shape == (B * S, E)
    # TODO(synk): second_expert_policy in {'sampling','random'},
    # batch_prioritized_routing (importance sort), and the
    # router_ignore_padding_tokens=False padding-mask path are not implemented
    # (module defaults only).
    print("KERNEL_OK")
</pallas_src>

<mosaic_0001>
module attributes {stable_mosaic.version = 11 : i64} {
  func.func @_router_topk_kernel(%arg0: i32, %arg1: memref<16x32xf32, #tpu.memory_space<vmem>>, %arg2: memref<32x128xf32, #tpu.memory_space<vmem>>, %arg3: memref<16x2xf32, #tpu.memory_space<vmem>>, %arg4: memref<16x2xi32, #tpu.memory_space<vmem>>, %arg5: memref<1x2x128xf32, #tpu.memory_space<vmem>>) attributes {dimension_semantics = [#tpu.dimension_semantics<parallel>], iteration_bounds = array<i64: 1>, scalar_prefetch = 0 : i64, scratch_operands = 0 : i64, tpu.core_type = #tpu.core_type<tc>, window_params = [{transform_indices = @transform_0, window_bounds = array<i64: 16, 32>}, {pipeline_mode = #tpu.pipeline_mode<synchronous>, transform_indices = @transform_1, window_bounds = array<i64: 32, 128>}, {transform_indices = @transform_2, window_bounds = array<i64: 16, 2>}, {transform_indices = @transform_3, window_bounds = array<i64: 16, 2>}, {transform_indices = @transform_4, window_bounds = array<i64: 1, 2, 128>}]} {
    %c0 = arith.constant 0 : index
    %c0_0 = arith.constant 0 : index
    %0 = vector.load %arg1[%c0, %c0_0] : memref<16x32xf32, #tpu.memory_space<vmem>>, vector<16x32xf32>
    %c0_1 = arith.constant 0 : index
    %c0_2 = arith.constant 0 : index
    %1 = vector.load %arg2[%c0_1, %c0_2] : memref<32x128xf32, #tpu.memory_space<vmem>>, vector<32x128xf32>
    %cst = arith.constant dense<0.000000e+00> : vector<16x128xf32>
    %2 = tpu.matmul %0, %1, %cst {dimension_numbers = #tpu.dot_dimension_numbers<[1], [0], [0], [1], [0, 0, 1, 1], [], []>} : vector<16x32xf32>, vector<32x128xf32>, vector<16x128xf32> -> vector<16x128xf32>
    %3 = tpu.iota {dimensions = array<i32: 1>} : vector<16x128xi32>
    %cst_3 = arith.constant dense<0xFF800000> : vector<16xf32>
    %4 = vector.multi_reduction <maximumf>, %2, %cst_3 [1] : vector<16x128xf32> to vector<16xf32>
    %5 = vector.shape_cast %4 : vector<16xf32> to vector<16x1xf32>
    %6 = vector.broadcast %5 : vector<16x1xf32> to vector<16x128xf32>
    %7 = arith.subf %2, %6 : vector<16x128xf32>
    %8 = math.exp %7 : vector<16x128xf32>
    %cst_4 = arith.constant dense<0.000000e+00> : vector<16xf32>
    %9 = vector.multi_reduction <add>, %8, %cst_4 [1] : vector<16x128xf32> to vector<16xf32>
    %10 = vector.shape_cast %9 : vector<16xf32> to vector<16x1xf32>
    %11 = tpu.reciprocal %10 {approx = true} : vector<16x1xf32> -> vector<16x1xf32>
    %12 = vector.broadcast %11 : vector<16x1xf32> to vector<16x128xf32>
    %13 = arith.mulf %8, %12 : vector<16x128xf32>
    %14 = vector.broadcast %5 : vector<16x1xf32> to vector<16x128xf32>
    %15 = arith.cmpf oeq, %2, %14 : vector<16x128xf32>
    %c128_i32 = arith.constant 128 : i32
    %16 = vector.broadcast %c128_i32 : i32 to vector<16x128xi32>
    %17 = arith.select %15, %3, %16 : vector<16x128xi1>, vector<16x128xi32>
    %cst_5 = arith.constant dense<2147483647> : vector<16xi32>
    %18 = vector.multi_reduction <minsi>, %17, %cst_5 [1] : vector<16x128xi32> to vector<16xi32>
    %19 = vector.shape_cast %18 : vector<16xi32> to vector<16x1xi32>
    %20 = vector.broadcast %19 : vector<16x1xi32> to vector<16x128xi32>
    %21 = arith.cmpi eq, %3, %20 : vector<16x128xi32>
    %cst_6 = arith.constant 0xFF800000 : f32
    %22 = vector.broadcast %cst_6 : f32 to vector<16x128xf32>
    %23 = arith.select %21, %22, %2 : vector<16x128xi1>, vector<16x128xf32>
    %cst_7 = arith.constant dense<0xFF800000> : vector<16xf32>
    %24 = vector.multi_reduction <maximumf>, %23, %cst_7 [1] : vector<16x128xf32> to vector<16xf32>
    %25 = vector.shape_cast %24 : vector<16xf32> to vector<16x1xf32>
    %26 = vector.broadcast %25 : vector<16x1xf32> to vector<16x128xf32>
    %27 = arith.cmpf oeq, %23, %26 : vector<16x128xf32>
    %c128_i32_8 = arith.constant 128 : i32
    %28 = vector.broadcast %c128_i32_8 : i32 to vector<16x128xi32>
    %29 = arith.select %27, %3, %28 : vector<16x128xi1>, vector<16x128xi32>
    %cst_9 = arith.constant dense<2147483647> : vector<16xi32>
    %30 = vector.multi_reduction <minsi>, %29, %cst_9 [1] : vector<16x128xi32> to vector<16xi32>
    %31 = vector.shape_cast %30 : vector<16xi32> to vector<16x1xi32>
    %32 = vector.broadcast %31 : vector<16x1xi32> to vector<16x128xi32>
    %33 = arith.cmpi eq, %3, %32 : vector<16x128xi32>
    %cst_10 = arith.constant 0.000000e+00 : f32
    %34 = vector.broadcast %cst_10 : f32 to vector<16x128xf32>
    %35 = arith.select %21, %13, %34 : vector<16x128xi1>, vector<16x128xf32>
    %cst_11 = arith.constant dense<0.000000e+00> : vector<16xf32>
    %36 = vector.multi_reduction <add>, %35, %cst_11 [1] : vector<16x128xf32> to vector<16xf32>
    %37 = vector.shape_cast %36 : vector<16xf32> to vector<16x1xf32>
    %cst_12 = arith.constant 0.000000e+00 : f32
    %38 = vector.broadcast %cst_12 : f32 to vector<16x128xf32>
    %39 = arith.select %33, %13, %38 : vector<16x128xi1>, vector<16x128xf32>
    %cst_13 = arith.constant dense<0.000000e+00> : vector<16xf32>
    %40 = vector.multi_reduction <add>, %39, %cst_13 [1] : vector<16x128xf32> to vector<16xf32>
    %41 = vector.shape_cast %40 : vector<16xf32> to vector<16x1xf32>
    %42 = arith.extui %21 : vector<16x128xi1> to vector<16x128xi32>
    %43 = arith.sitofp %42 : vector<16x128xi32> to vector<16x128xf32>
    %cst_14 = arith.constant dense<0.000000e+00> : vector<128xf32>
    %44 = vector.multi_reduction <add>, %43, %cst_14 [0] : vector<16x128xf32> to vector<128xf32>
    %45 = vector.shape_cast %44 : vector<128xf32> to vector<1x128xf32>
    %46 = arith.extui %33 : vector<16x128xi1> to vector<16x128xi32>
    %47 = arith.sitofp %46 : vector<16x128xi32> to vector<16x128xf32>
    %cst_15 = arith.constant dense<0.000000e+00> : vector<128xf32>
    %48 = vector.multi_reduction <add>, %47, %cst_15 [0] : vector<16x128xf32> to vector<128xf32>
    %49 = vector.shape_cast %48 : vector<128xf32> to vector<1x128xf32>
    %50 = tpu.concatenate %37, %41 in 1 : vector<16x1xf32>, vector<16x1xf32> -> vector<16x2xf32>
    %c0_16 = arith.constant 0 : index
    %c0_17 = arith.constant 0 : index
    %51 = vector.load %arg3[%c0_16, %c0_17] : memref<16x2xf32, #tpu.memory_space<vmem>>, vector<16x2xf32>
    tpu.vector_store %arg3[%c0_16, %c0_17], %50 {strides = array<i32>} : memref<16x2xf32, #tpu.memory_space<vmem>>, vector<16x2xf32>,
    %52 = tpu.concatenate %19, %31 in 1 : vector<16x1xi32>, vector<16x1xi32> -> vector<16x2xi32>
    %c0_18 = arith.constant 0 : index
    %c0_19 = arith.constant 0 : index
    %53 = vector.load %arg4[%c0_18, %c0_19] : memref<16x2xi32, #tpu.memory_space<vmem>>, vector<16x2xi32>
    tpu.vector_store %arg4[%c0_18, %c0_19], %52 {strides = array<i32>} : memref<16x2xi32, #tpu.memory_space<vmem>>, vector<16x2xi32>,
    %54 = tpu.concatenate %45, %49 in 0 : vector<1x128xf32>, vector<1x128xf32> -> vector<2x128xf32>
    %55 = vector.shape_cast %54 : vector<2x128xf32> to vector<1x2x128xf32>
    %c0_20 = arith.constant 0 : index
    %c0_21 = arith.constant 0 : index
    %c0_22 = arith.constant 0 : index
    %56 = vector.load %arg5[%c0_20, %c0_21, %c0_22] : memref<1x2x128xf32, #tpu.memory_space<vmem>>, vector<1x2x128xf32>
    tpu.vector_store %arg5[%c0_20, %c0_21, %c0_22], %55 {strides = array<i32>} : memref<1x2x128xf32, #tpu.memory_space<vmem>>, vector<1x2x128xf32>,
    return
  }
  func.func @transform_0(%arg0: i32) -> (i32, i32) {
    %c0_i32 = arith.constant 0 : i32
    %c0_i32_0 = arith.constant 0 : i32
    return %arg0, %c0_i32 : i32, i32
  }
  func.func @transform_1(%arg0: i32) -> (i32, i32) {
    %c0_i32 = arith.constant 0 : i32
    %c0_i32_0 = arith.constant 0 : i32
    %c0_i32_1 = arith.constant 0 : i32
    return %c0_i32, %c0_i32_0 : i32, i32
  }
  func.func @transform_2(%arg0: i32) -> (i32, i32) {
    %c0_i32 = arith.constant 0 : i32
    %c0_i32_0 = arith.constant 0 : i32
    return %arg0, %c0_i32 : i32, i32
  }
  func.func @transform_3(%arg0: i32) -> (i32, i32) {
    %c0_i32 = arith.constant 0 : i32
    %c0_i32_0 = arith.constant 0 : i32
    return %arg0, %c0_i32 : i32, i32
  }
  func.func @transform_4(%arg0: i32) -> (i32, i32, i32) {
    %c0_i32 = arith.constant 0 : i32
    %c0_i32_0 = arith.constant 0 : i32
    %c0_i32_1 = arith.constant 0 : i32
    return %arg0, %c0_i32, %c0_i32_0 : i32, i32, i32
  }
}

</mosaic_0001>

<bundles_post_ra>
// kernel: tpu_custom_call.1
= control target key start
LH: loop header
LB: loop body
LE: loop exit
PB: predicated region body
PF: predicated region fallthrough
CT: control target
= control target key end

     0   :  { %10 = vsyncpa [#allocation3], 0  ;;  %s448_s0 = inlined_call_operand.hbm [shape: f32[16,32], index: 0, kind: input, shape index: {}]   ;;  %s449_s1 = inlined_call_operand.hbm [shape: f32[32,128], index: 1, kind: input, shape index: {}]   ;;  %s450_s2 = inlined_call_operand.vmem [shape: f32[16,2], index: 2, kind: output, shape index: {0}]   ;;  %s451_s3 = inlined_call_operand.vmem [shape: s32[16,2], index: 3, kind: output, shape index: {1}]   ;;  %s452_s4 = inlined_call_operand.hbm [shape: f32[1,2,128], index: 4, kind: output, shape index: {2}]  }
   0x1   :  { %11 = vsyncpa [#allocation6], 0 }
   0x2   :  { %12 = vsyncpa [#allocation4], 0  ;;  %s17_s17 = sshll.u32 %s448_s0, 4  ;;  %s352_s18 = smov [#allocation2]   ;;  %s18_s17 = int_to_ptr.hbm [resolvable:$true] %s17_s17 }
   0x3   :  { %s19_s19 = sshll.u32 %s352_s18, 4  ;;  %s30_s22 = sshll.u32 %s449_s1, 4  ;;  %s20_s19 = int_to_ptr.vmem [resolvable:$true] %s19_s19  ;;  %s31_s22 = int_to_ptr.hbm [resolvable:$true] %s30_s22 }
   0x4   :  { %s353_s23 = smov 128   ;;  %s354_s24 = smov 8  }
   0x5   :  { %25 = dma.hbm_to_vmem [thread:$0]  %s18_s17, 256, %s20_s19, [#allocation3], %s353_s23, %s353_s23, %s354_s24  }
   0x6   :  { %s355_s25 = smov [#allocation5]  }
   0x7   :  { %s32_s26 = sshll.u32 %s355_s25, 4  ;;  %s33_s26 = int_to_ptr.vmem [resolvable:$true] %s32_s26 }
   0x8   :  { %38 = dma.hbm_to_vmem [thread:$0]  %s31_s22, 512, %s33_s26, [#allocation6], %s353_s23, %s353_s23, %s354_s24  }
   0x9   :  { %346 = dma.done.wait [#allocation3], 256  }
   0xa   :  { %347 = vsyncadd [#allocation3], 4294967040 }
   0xb   :  { %348 = dma.done.wait [#allocation6], 512  }
   0xc   :  { %349 = vsyncadd [#allocation6], 4294966784  ;;  %v52_v0 = vld [vmem:[#allocation5 + $0x18] sm:$0xff]  ;;  %v51_v1 = vld [vmem:[#allocation5 + $0x10] sm:$0xff]  ;;  %vm53_vm0 = vcmask 261120   ;;  %v83_v8 = vlaneseq  ;;  %vm211_vm11 = vcmask 7168  }
   0xd   :  { %72 = vmatpush.msra.mxu0 %v52_v0  ;;  %256 = vmatpush.msra.mxu1 %v52_v0  ;;  %v50_v2 = vld [vmem:[#allocation5 + $0x8] sm:$0xff]  ;;  %v49_v3 = vld [vmem:[#allocation5] sm:$0xff]  ;;  %v47_v4 = vld [vmem:[#allocation2] sm:$0xff]  ;;  %vm214_vm12 = vcmask 15360   ;;  %s357_s29 = smov [#allocation7]   ;;  %s235_s7 = sshll.u32 %s452_s4, 4  ;;  %s236_s7 = int_to_ptr.hbm [resolvable:$true] %s235_s7 }
   0xe   :  { %v48_v5 = vld [vmem:[#allocation2 + $0x8] sm:$0xff]  ;;  %v389_v9 = vand.u32 127, %v83_v8  ;;  %s233_s30 = sshll.u32 %s357_s29, 4  ;;  %vm221_vm15 = vcmask 1040384   ;;  %s234_s30 = int_to_ptr.vmem [resolvable:$true] %s233_s30 }
   0xf   :  { %73 = vmatpush.msra.mxu0 %v51_v1  ;;  %257 = vmatpush.msra.mxu1 %v51_v1 }
  0x11   :  { %74 = vmatpush.msra.mxu0 %v50_v2  ;;  %258 = vmatpush.msra.mxu1 %v50_v2 }
  0x13   :  { %75 = vmatpush.msra.mxu0 %v49_v3  ;;  %259 = vmatpush.msra.mxu1 %v49_v3 }
  0x14   :  { %250 = vmatmul.msk.f32.vlgmr.msra.gmra.mxu0 %vm53_vm0, %v47_v4  ;;  %251 = vmatmul.msk.f32.vlgmr.msra.gmra.mxu1 %vm53_vm0, %v48_v5  ;;  %v356_v5 = vmov 0.0  }
  0x91   :  { %v77_v6 = vpop.f32.mrf.mxu0  ;;  %v80_v7 = vpop.f32.mrf.mxu1 }
  0x92   :  { %85 = vmax.xlane.f32.xlu0 %v77_v6 }
  0x9a   :  { %87 = vmax.xlane.f32.xlu0 %v80_v7 }
 0x105   :  { %v86_v10 = vpop.xlane.xlu0 %85 }
 0x106   :  { %vm103_vm1 = vcmp.eq.f32.partialorder %v77_v6, %v86_v10  ;;  %v89_v33 = vsub.f32 %v77_v6, %v86_v10 }
 0x107   :  { %v105_v11 = vsel %vm103_vm1, %v389_v9, 128 }
 0x108   :  { %v108_v12 = vshra.s32 %v105_v11, 16  ;;  %v107_v18 = vand.u32 65535, %v105_v11  ;;  %v91_v38 = vmul.f32 1.442695, %v89_v33 }
 0x10a   :  { %v110_v13 = vcvt.s32.f32 %v108_v12  ;;  %v109_v20 = vcvt.s32.f32 %v107_v18  ;;  %266 = vpow2.f32 %v91_v38 }
 0x10c   :  { %111 = vmin.xlane.f32.xlu1 %v110_v13 }
 0x10d   :  { %v88_v14 = vpop.xlane.xlu0 %87 }
 0x10e   :  { %vm104_vm2 = vcmp.eq.f32.partialorder %v80_v7, %v88_v14  ;;  %v90_v41 = vsub.f32 %v80_v7, %v88_v14 }
 0x10f   :  { %v106_v15 = vsel %vm104_vm2, %v389_v9, 128 }
 0x110   :  { %v122_v16 = vshra.s32 %v106_v15, 16  ;;  %v121_v22 = vand.u32 65535, %v106_v15  ;;  %v267_v40 = vpop.eup %266  ;;  %v93_v45 = vmul.f32 1.442695, %v90_v41 }
 0x112   :  { %v124_v17 = vcvt.s32.f32 %v122_v16  ;;  %v123_v24 = vcvt.s32.f32 %v121_v22  ;;  %268 = vpow2.f32 %v93_v45 }
 0x114   :  { %125 = vmin.xlane.f32.xlu1 %v124_v17 }
 0x118   :  { %v269_v51 = vpop.eup %268 }
 0x17f   :  { %v112_v19 = vpop.xlane.xlu1 %111 }
 0x180   :  { %vm113_vm3 = vcmp.eq.f32.partialorder %v110_v13, %v112_v19  ;;  %v118_v26 = vcvt.f32.s32 %v112_v19 }
 0x181   :  { %v114_v21 = vsel %vm113_vm3, %v109_v20, inf }
 0x182   :  { %115 = vmin.xlane.f32.xlu2 %v114_v21  ;;  %v119_v28 = vshll.u32 %v118_v26, 16 }
 0x187   :  { %v126_v23 = vpop.xlane.xlu1 %125 }
 0x188   :  { %vm127_vm4 = vcmp.eq.f32.partialorder %v124_v17, %v126_v23  ;;  %v132_v31 = vcvt.f32.s32 %v126_v23 }
 0x189   :  { %v128_v25 = vsel %vm127_vm4, %v123_v24, inf }
 0x18a   :  { %129 = vmin.xlane.f32.xlu2 %v128_v25  ;;  %v133_v35 = vshll.u32 %v132_v31, 16 }
 0x1f5   :  { %v116_v27 = vpop.xlane.xlu2 %115 }
 0x1f6   :  { %v117_v29 = vcvt.f32.s32 %v116_v27 }
 0x1f8   :  { %v393_v30 = vadd.s32 %v119_v28, %v117_v29 }
 0x1fa   :  { %vm135_vm5 = vcmp.eq.s32.totalorder %v389_v9, %v393_v30 }
 0x1fb   :  { %v137_v32 = vsel %vm135_vm5, -inf, %v77_v6  ;;  %v252_v11 = vsel %vm135_vm5, 1.0, %v356_v5 }
 0x1fc   :  { %139 = vmax.xlane.f32.xlu0 %v137_v32 }
 0x1fd   :  { %v130_v34 = vpop.xlane.xlu2 %129 }
 0x1fe   :  { %v131_v36 = vcvt.f32.s32 %v130_v34 }
 0x200   :  { %v400_v37 = vadd.s32 %v133_v35, %v131_v36 }
 0x202   :  { %vm136_vm6 = vcmp.eq.s32.totalorder %v389_v9, %v400_v37 }
 0x203   :  { %v138_v39 = vsel %vm136_vm6, -inf, %v80_v7  ;;  %v253_v6 = vsel %vm136_vm6, 1.0, %v356_v5 }
 0x204   :  { %141 = vmax.xlane.f32.xlu1 %v138_v39  ;;  %v193_v12 = vadd.f32 %v253_v6, %v252_v11 }
 0x206   :  { %v194_v17 = vrot.slane %v193_v12, 4 }
 0x208   :  { %v195_v21 = vadd.f32 %v194_v17, %v193_v12 }
 0x20a   :  { %v196_v27 = vrot.slane %v195_v21, 2 }
 0x20c   :  { %95 = vadd.xlane.f32.xlu1 %v267_v40 }
 0x26f   :  { %v140_v42 = vpop.xlane.xlu0 %139 }
 0x270   :  { %vm143_vm7 = vcmp.eq.f32.partialorder %v137_v32, %v140_v42 }
 0x271   :  { %v145_v43 = vsel %vm143_vm7, %v389_v9, 128 }
 0x272   :  { %v148_v44 = vshra.s32 %v145_v43, 16  ;;  %v147_v56 = vand.u32 65535, %v145_v43 }
 0x274   :  { %v150_v46 = vcvt.s32.f32 %v148_v44  ;;  %v149_v58 = vcvt.s32.f32 %v147_v56 }
 0x276   :  { %151 = vmin.xlane.f32.xlu2 %v150_v46 }
 0x277   :  { %v142_v47 = vpop.xlane.xlu1 %141 }
 0x278   :  { %vm144_vm8 = vcmp.eq.f32.partialorder %v138_v39, %v142_v47 }
 0x279   :  { %v146_v48 = vsel %vm144_vm8, %v389_v9, 128 }
 0x27a   :  { %v162_v49 = vshra.s32 %v146_v48, 16  ;;  %v161_v60 = vand.u32 65535, %v146_v48 }
 0x27c   :  { %v164_v50 = vcvt.s32.f32 %v162_v49  ;;  %v163_v63 = vcvt.s32.f32 %v161_v60 }
 0x27e   :  { %165 = vmin.xlane.f32.xlu0 %v164_v50  ;;  %97 = vadd.xlane.f32.xlu2 %v269_v51 }
 0x27f   :  { %v96_v52 = vpop.xlane.xlu1 %95 }
 0x280   :  { %270 = vrcp.f32 %v96_v52 }
 0x286   :  { %v271_v53 = vpop.eup %270 }
 0x287   :  { %v101_v54 = vmul.f32 %v271_v53, %v267_v40 }
 0x289   :  { %v177_v55 = vsel %vm135_vm5, %v101_v54, 0.0 }
 0x28a   :  { %179 = vadd.xlane.f32.xlu2 %v177_v55 }
 0x2e9   :  { %v152_v57 = vpop.xlane.xlu2 %151 }
 0x2ea   :  { %vm153_vm9 = vcmp.eq.f32.partialorder %v150_v46, %v152_v57  ;;  %v158_v4 = vcvt.f32.s32 %v152_v57 }
 0x2eb   :  { %v154_v59 = vsel %vm153_vm9, %v149_v58, inf }
 0x2ec   :  { %155 = vmin.xlane.f32.xlu0 %v154_v59  ;;  %v159_v8 = vshll.u32 %v158_v4, 16 }
 0x2f1   :  { %v98_v61 = vpop.xlane.xlu2 %97  ;;  %v166_v62 = vpop.xlane.xlu0 %165 }
 0x2f2   :  { %272 = vrcp.f32 %v98_v61  ;;  %vm167_vm10 = vcmp.eq.f32.partialorder %v164_v50, %v166_v62  ;;  %v172_v14 = vcvt.f32.s32 %v166_v62 }
 0x2f3   :  { %v168_v0 = vsel %vm167_vm10, %v163_v63, inf }
 0x2f4   :  { %169 = vmin.xlane.f32.xlu1 %v168_v0  ;;  %v173_v19 = vshll.u32 %v172_v14, 16 }
 0x2f8   :  { %v273_v1 = vpop.eup %272 }
 0x2f9   :  { %v102_v2 = vmul.f32 %v273_v1, %v269_v51 }
 0x2fb   :  { %v178_v3 = vsel %vm136_vm6, %v102_v2, 0.0 }
 0x2fc   :  { %181 = vadd.xlane.f32.xlu0 %v178_v3 }
 0x2fd   :  { %v180_v38 = vpop.xlane.xlu2 %179 }
 0x35f   :  { %v156_v7 = vpop.xlane.xlu0 %155 }
 0x360   :  { %v157_v10 = vcvt.f32.s32 %v156_v7 }
 0x362   :  { %v160_v13 = vadd.s32 %v159_v8, %v157_v10 }
 0x364   :  { %vm175_vm13 = vcmp.eq.s32.totalorder %v389_v9, %v160_v13  ;;  %v217_v15 = vsel %vm211_vm11, %v393_v30, %v160_v13  ;;  %v197_v30 = vadd.f32 %v196_v27, %v195_v21 }
 0x365   :  { %v183_v16 = vsel %vm175_vm13, %v101_v54, 0.0  ;;  %219 = vst.msk [vmem:[%s451_s3] sm:$0xff] %vm214_vm12, %v217_v15  ;;  %v254_v24 = vsel %vm175_vm13, 1.0, %v356_v5 }
 0x366   :  { %185 = vadd.xlane.f32.xlu1 %v183_v16 }
 0x367   :  { %v170_v18 = vpop.xlane.xlu1 %169 }
 0x368   :  { %v171_v20 = vcvt.f32.s32 %v170_v18 }
 0x36a   :  { %v174_v22 = vadd.s32 %v173_v19, %v171_v20 }
 0x36c   :  { %vm176_vm14 = vcmp.eq.s32.totalorder %v389_v9, %v174_v22  ;;  %v218_v23 = vsel %vm211_vm11, %v400_v37, %v174_v22  ;;  %v198_v9 = vrot.slane %v197_v30, 1 }
 0x36d   :  { %v184_v25 = vsel %vm176_vm14, %v102_v2, 0.0  ;;  %v255_v26 = vsel %vm176_vm14, 1.0, %v356_v5  ;;  %220 = vst.msk [vmem:[%s451_s3 + $0x8] sm:$0xff] %vm214_vm12, %v218_v23 }
 0x36e   :  { %187 = vadd.xlane.f32.xlu2 %v184_v25  ;;  %v204_v28 = vadd.f32 %v255_v26, %v254_v24  ;;  %v199_v35 = vadd.f32 %v198_v9, %v197_v30 }
 0x36f   :  { %v182_v41 = vpop.xlane.xlu0 %181 }
 0x370   :  { %v205_v29 = vrot.slane %v204_v28, 4 }
 0x372   :  { %v206_v31 = vadd.f32 %v205_v29, %v204_v28 }
 0x374   :  { %v207_v32 = vrot.slane %v206_v31, 2 }
 0x376   :  { %v208_v33 = vadd.f32 %v207_v32, %v206_v31 }
 0x378   :  { %v209_v34 = vrot.slane %v208_v33, 1 }
 0x37a   :  { %v210_v36 = vadd.f32 %v209_v34, %v208_v33 }
 0x37c   :  { %v222_v37 = vsel %vm221_vm15, %v199_v35, %v210_v36 }
 0x37d   :  { %223 = vst [vmem:[#allocation7] sm:$0x3] %v222_v37 }
 0x37e   :  { %238 = dma.vmem_to_hbm [thread:$0]  %s234_s30, 32, %s236_s7, [#allocation4]  }
 0x3d9   :  { %v186_v39 = vpop.xlane.xlu1 %185 }
 0x3da   :  { %v212_v40 = vsel %vm211_vm11, %v180_v38, %v186_v39 }
 0x3db   :  { %215 = vst.msk [vmem:[%s450_s2] sm:$0xff] %vm214_vm12, %v212_v40 }
 0x3e1   :  { %v188_v42 = vpop.xlane.xlu2 %187 }
 0x3e2   :  { %v213_v43 = vsel %vm211_vm11, %v182_v41, %v188_v42 }
 0x3e3   :  { %216 = vst.msk [vmem:[%s450_s2 + $0x8] sm:$0xff] %vm214_vm12, %v213_v43 }
 0x3e4   :  { %350 = dma.done.wait [#allocation4], 32  }
 0x3e5   :  { %351 = vsyncadd [#allocation4], 4294967264 }
 0x3e6   :  { %247 = vsyncpa [#allocation3], 1 }
 0x3e7   :  { %248 = vsyncpa [#allocation6], 1 }
 0x3e8   :  { %249 = vsyncpa [#allocation4], 1 }

</bundles_post_ra>
